<compile_context>
chip_gen: v6e
topology: v6e:2x2x1
jax: 0.10.0
libtpu: 0.0.40
codegen_flags: <defaults>
</compile_context>

<pallas_src>
import functools

import jax
import jax.numpy as jnp
from jax.experimental import pallas as pl
from jax.experimental.pallas import tpu as pltpu


def _make_moi_kernel(C, apply_noise):
    """Build the kernel specialized on channel count and the noise path."""

    def kernel(*refs):
        if apply_noise:
            x_ref, m_ref, n_ref, w_ref, o_ref = refs
        else:
            x_ref, m_ref, w_ref, o_ref = refs
            n_ref = None

        # x_ref / n_ref : (BB, C, T) f32   image / noise tile
        # m_ref         : (C, T)           mask of the sampled operator (batch-constant)
        # w_ref         : (C, C) f32       reconstruction weights, in SMEM
        # o_ref         : (1, 1, 1, T) f32 lane-dense partial sum of squared errors
        x = x_ref[...]                                   # (BB, C, T)
        m = m_ref[...].astype(jnp.float32)[None, :, :]   # (1, C, T) broadcast over BB

        # physics[j](x_net): full sensing model y = A_j x (+ noise when enabled)
        y = m * x
        if apply_noise:
            y = y + n_ref[...]
        # adjoint of the diagonal masking operator (general, non-binary masks)
        xa = m * y

        # f(y, A_j): per-sample 1x1-conv channel mix as C^2 scalar broadcast
        # FMAs on the VPU (weights are SMEM scalars).  The kernel is HBM-bound,
        # so this stays pure filler under the DMAs; no MXU / kron needed.
        acc = None
        for co in range(C):
            r = w_ref[co, 0] * xa[:, 0:1, :]             # (BB, 1, T)
            for ci in range(1, C):
                r = r + w_ref[co, ci] * xa[:, ci:ci + 1, :]
            d = r - x[:, co:co + 1, :]
            sq = d * d
            acc = sq if acc is None else acc + sq        # (BB, 1, T)

        # One small lane-dense partial per grid step; final sum in the wrapper.
        o_ref[...] = jnp.sum(acc, axis=0)[None, None, :, :]   # (1, 1, 1, T)

    return kernel


def moi_loss(x_net, masks, noise, w_rec, j, weight=1.0, apply_noise=True,
             batch_block=None, hw_tile=None):
    """weight * MSE(f(physics[j](x_net), physics[j]), x_net) via a Pallas kernel."""
    B, C, H, W = x_net.shape
    HW = H * W

    # --- HW tiling: pick the largest "nice" lane-dense tile that divides HW.
    # (Per-generation tuning: ~512-1024 lanes is the HBM-roofline plateau; on
    # v7x keep per-input blocks at a few MiB to fit the 64 MiB VMEM.)
    if hw_tile is None:
        for cand in (2048, 1024, 512, 256, 128):
            if HW % cand == 0:
                hw_tile = cand
                break
        else:
            hw_tile = HW
    assert HW % hw_tile == 0, "hw_tile must divide H*W"
    num_hw = HW // hw_tile

    # --- Batch blocking: prefer >=2 batch blocks so v7x's two TensorCores both
    # get independent "parallel" work even when num_hw == 1.
    if batch_block is None:
        batch_block = B // 2 if (B >= 2 and B % 2 == 0) else B
    BB = batch_block
    assert B % BB == 0, "batch must be divisible by the batch block size"
    num_bb = B // BB

    x3 = x_net.reshape(B, C, HW).astype(jnp.float32)
    # j is drawn host-side (np.random.randint in the torch module) -> static
    # Python int, so selecting the operator's mask is a free static slice.
    # The mask is NOT broadcast over the batch; it is streamed once per HW tile.
    m2 = masks[j].reshape(C, HW)
    w = w_rec.astype(jnp.float32)

    kernel = _make_moi_kernel(C, apply_noise)

    # Block layouts: second-minor dim == full channel dim, so there is no
    # (BB*C) % 8 constraint; lane dim is hw_tile (multiple of 128 or full HW).
    in_specs = [
        pl.BlockSpec((BB, C, hw_tile), lambda h, b: (b, 0, h)),   # x_net
        pl.BlockSpec((C, hw_tile),     lambda h, b: (0, h)),      # mask (constant along b)
    ]
    operands = [x3, m2]
    if apply_noise:
        n3 = noise.reshape(B, C, HW).astype(jnp.float32)
        in_specs.append(pl.BlockSpec((BB, C, hw_tile), lambda h, b: (b, 0, h)))
        operands.append(n3)
    # (C, C) weights live in SMEM: cheap scalar reads, no VMEM double-buffer.
    in_specs.append(pl.BlockSpec(memory_space=pltpu.MemorySpace.SMEM))
    operands.append(w)

    # Grid: hw tiles outer, batch blocks inner.  The mask's block index only
    # depends on the hw axis, so its DMA is skipped across the inner batch
    # steps.  Every grid point writes an independent output block, so both
    # axes are "parallel" (shardable across v7x's 2 TCs).
    partials = pl.pallas_call(
        kernel,
        out_shape=jax.ShapeDtypeStruct((num_hw, num_bb, 1, hw_tile), jnp.float32),
        grid=(num_hw, num_bb),
        in_specs=in_specs,
        out_specs=pl.BlockSpec((1, 1, 1, hw_tile), lambda h, b: (h, b, 0, 0)),
        compiler_params=pltpu.CompilerParams(
            dimension_semantics=("parallel", "parallel"),
            vmem_limit_bytes=32 * 1024 * 1024),
    )(*operands)

    sse = jnp.sum(partials)
    return weight * sse / (B * C * HW)


def moi_loss_ref(x_net, masks, noise, w_rec, j, weight=1.0, apply_noise=True):
    """Pure-JAX reference with identical semantics."""
    B, C, H, W = x_net.shape
    x = x_net.reshape(B, C, -1).astype(jnp.float32)
    m = masks[j].reshape(C, -1).astype(jnp.float32)
    y = m[None] * x
    if apply_noise:
        y = y + noise.reshape(B, C, -1).astype(jnp.float32)
    xa = m[None] * y
    x2 = jnp.einsum("oc,bcp->bop", w_rec.astype(jnp.float32), xa)
    return weight * jnp.mean((x2 - x) ** 2)


if __name__ == "__main__":
    key = jax.random.PRNGKey(0)
    B, C, H, W, G = 2, 4, 16, 16, 3
    k1, k2, k3, k4, k5 = jax.random.split(key, 5)

    x_net = jax.random.normal(k1, (B, C, H, W), jnp.float32)
    # G binary masking operators (random inpainting-style physics)
    masks = (jax.random.uniform(k2, (G, C, H, W)) > 0.5).astype(jnp.float32)
    sigma = 0.05
    noise = sigma * jax.random.normal(k3, (B, C, H, W), jnp.float32)
    # deterministic reconstruction (1x1 conv) weights
    w_rec = jax.random.normal(k4, (C, C), jnp.float32) / jnp.sqrt(C)
    # torch module draws j = np.random.randint(G); deterministic host draw here
    j = int(jax.random.randint(k5, (), 0, G))

    # hw_tile=128, batch_block=1 -> grid (2, 2): exercises the HW-tile axis and
    # gives >=2 independent parallel blocks (pipelining + megacore sharding).
    loss = jax.block_until_ready(
        moi_loss(x_net, masks, noise, w_rec, j, weight=1.0,
                 apply_noise=True, batch_block=1, hw_tile=128))
    ref = moi_loss_ref(x_net, masks, noise, w_rec, j, weight=1.0, apply_noise=True)
    assert jnp.allclose(loss, ref, rtol=1e-5, atol=1e-5), (loss, ref)
    print("KERNEL_OK")
</pallas_src>

<mosaic_0001>
module attributes {stable_mosaic.version = 11 : i64} {
  func.func @kernel(%arg0: i32, %arg1: i32, %arg2: memref<1x4x128xf32, #tpu.memory_space<vmem>>, %arg3: memref<4x128xf32, #tpu.memory_space<vmem>>, %arg4: memref<1x4x128xf32, #tpu.memory_space<vmem>>, %arg5: memref<4x4xf32, #tpu.memory_space<smem>>, %arg6: memref<1x1x1x128xf32, #tpu.memory_space<vmem>>) attributes {dimension_semantics = [#tpu.dimension_semantics<parallel>, #tpu.dimension_semantics<parallel>], iteration_bounds = array<i64: 2, 2>, scalar_prefetch = 0 : i64, scratch_operands = 0 : i64, tpu.core_type = #tpu.core_type<tc>, window_params = [{transform_indices = @transform_0, window_bounds = array<i64: 1, 4, 128>}, {transform_indices = @transform_1, window_bounds = array<i64: 4, 128>}, {transform_indices = @transform_2, window_bounds = array<i64: 1, 4, 128>}, {transform_indices = @transform_3, window_bounds = array<i64: 4, 4>}, {transform_indices = @transform_4, window_bounds = array<i64: 1, 1, 1, 128>}]} {
    %c0 = arith.constant 0 : index
    %c0_0 = arith.constant 0 : index
    %c0_1 = arith.constant 0 : index
    %0 = vector.load %arg2[%c0, %c0_0, %c0_1] : memref<1x4x128xf32, #tpu.memory_space<vmem>>, vector<1x4x128xf32>
    %c0_2 = arith.constant 0 : index
    %c0_3 = arith.constant 0 : index
    %1 = vector.load %arg3[%c0_2, %c0_3] : memref<4x128xf32, #tpu.memory_space<vmem>>, vector<4x128xf32>
    %2 = vector.shape_cast %1 : vector<4x128xf32> to vector<1x4x128xf32>
    %3 = arith.mulf %2, %0 : vector<1x4x128xf32>
    %c0_4 = arith.constant 0 : index
    %c0_5 = arith.constant 0 : index
    %c0_6 = arith.constant 0 : index
    %4 = vector.load %arg4[%c0_4, %c0_5, %c0_6] : memref<1x4x128xf32, #tpu.memory_space<vmem>>, vector<1x4x128xf32>
    %5 = arith.addf %3, %4 : vector<1x4x128xf32>
    %6 = arith.mulf %2, %5 : vector<1x4x128xf32>
    %c0_7 = arith.constant 0 : index
    %c0_8 = arith.constant 0 : index
    %7 = memref.load %arg5[%c0_7, %c0_8] : memref<4x4xf32, #tpu.memory_space<smem>>
    %8 = vector.extract_strided_slice %6 {offsets = [0, 0, 0], sizes = [1, 1, 128], strides = [1, 1, 1]} : vector<1x4x128xf32> to vector<1x1x128xf32>
    %9 = vector.broadcast %7 : f32 to vector<1x1x128xf32>
    %10 = arith.mulf %9, %8 : vector<1x1x128xf32>
    %c0_9 = arith.constant 0 : index
    %c1 = arith.constant 1 : index
    %11 = memref.load %arg5[%c0_9, %c1] : memref<4x4xf32, #tpu.memory_space<smem>>
    %12 = vector.extract_strided_slice %6 {offsets = [0, 1, 0], sizes = [1, 1, 128], strides = [1, 1, 1]} : vector<1x4x128xf32> to vector<1x1x128xf32>
    %13 = vector.broadcast %11 : f32 to vector<1x1x128xf32>
    %14 = arith.mulf %13, %12 : vector<1x1x128xf32>
    %15 = arith.addf %10, %14 : vector<1x1x128xf32>
    %c0_10 = arith.constant 0 : index
    %c2 = arith.constant 2 : index
    %16 = memref.load %arg5[%c0_10, %c2] : memref<4x4xf32, #tpu.memory_space<smem>>
    %17 = vector.extract_strided_slice %6 {offsets = [0, 2, 0], sizes = [1, 1, 128], strides = [1, 1, 1]} : vector<1x4x128xf32> to vector<1x1x128xf32>
    %18 = vector.broadcast %16 : f32 to vector<1x1x128xf32>
    %19 = arith.mulf %18, %17 : vector<1x1x128xf32>
    %20 = arith.addf %15, %19 : vector<1x1x128xf32>
    %c0_11 = arith.constant 0 : index
    %c3 = arith.constant 3 : index
    %21 = memref.load %arg5[%c0_11, %c3] : memref<4x4xf32, #tpu.memory_space<smem>>
    %22 = vector.extract_strided_slice %6 {offsets = [0, 3, 0], sizes = [1, 1, 128], strides = [1, 1, 1]} : vector<1x4x128xf32> to vector<1x1x128xf32>
    %23 = vector.broadcast %21 : f32 to vector<1x1x128xf32>
    %24 = arith.mulf %23, %22 : vector<1x1x128xf32>
    %25 = arith.addf %20, %24 : vector<1x1x128xf32>
    %26 = vector.extract_strided_slice %0 {offsets = [0, 0, 0], sizes = [1, 1, 128], strides = [1, 1, 1]} : vector<1x4x128xf32> to vector<1x1x128xf32>
    %27 = arith.subf %25, %26 : vector<1x1x128xf32>
    %28 = arith.mulf %27, %27 : vector<1x1x128xf32>
    %c1_12 = arith.constant 1 : index
    %c0_13 = arith.constant 0 : index
    %29 = memref.load %arg5[%c1_12, %c0_13] : memref<4x4xf32, #tpu.memory_space<smem>>
    %30 = vector.extract_strided_slice %6 {offsets = [0, 0, 0], sizes = [1, 1, 128], strides = [1, 1, 1]} : vector<1x4x128xf32> to vector<1x1x128xf32>
    %31 = vector.broadcast %29 : f32 to vector<1x1x128xf32>
    %32 = arith.mulf %31, %30 : vector<1x1x128xf32>
    %c1_14 = arith.constant 1 : index
    %c1_15 = arith.constant 1 : index
    %33 = memref.load %arg5[%c1_14, %c1_15] : memref<4x4xf32, #tpu.memory_space<smem>>
    %34 = vector.extract_strided_slice %6 {offsets = [0, 1, 0], sizes = [1, 1, 128], strides = [1, 1, 1]} : vector<1x4x128xf32> to vector<1x1x128xf32>
    %35 = vector.broadcast %33 : f32 to vector<1x1x128xf32>
    %36 = arith.mulf %35, %34 : vector<1x1x128xf32>
    %37 = arith.addf %32, %36 : vector<1x1x128xf32>
    %c1_16 = arith.constant 1 : index
    %c2_17 = arith.constant 2 : index
    %38 = memref.load %arg5[%c1_16, %c2_17] : memref<4x4xf32, #tpu.memory_space<smem>>
    %39 = vector.extract_strided_slice %6 {offsets = [0, 2, 0], sizes = [1, 1, 128], strides = [1, 1, 1]} : vector<1x4x128xf32> to vector<1x1x128xf32>
    %40 = vector.broadcast %38 : f32 to vector<1x1x128xf32>
    %41 = arith.mulf %40, %39 : vector<1x1x128xf32>
    %42 = arith.addf %37, %41 : vector<1x1x128xf32>
    %c1_18 = arith.constant 1 : index
    %c3_19 = arith.constant 3 : index
    %43 = memref.load %arg5[%c1_18, %c3_19] : memref<4x4xf32, #tpu.memory_space<smem>>
    %44 = vector.extract_strided_slice %6 {offsets = [0, 3, 0], sizes = [1, 1, 128], strides = [1, 1, 1]} : vector<1x4x128xf32> to vector<1x1x128xf32>
    %45 = vector.broadcast %43 : f32 to vector<1x1x128xf32>
    %46 = arith.mulf %45, %44 : vector<1x1x128xf32>
    %47 = arith.addf %42, %46 : vector<1x1x128xf32>
    %48 = vector.extract_strided_slice %0 {offsets = [0, 1, 0], sizes = [1, 1, 128], strides = [1, 1, 1]} : vector<1x4x128xf32> to vector<1x1x128xf32>
    %49 = arith.subf %47, %48 : vector<1x1x128xf32>
    %50 = arith.mulf %49, %49 : vector<1x1x128xf32>
    %51 = arith.addf %28, %50 : vector<1x1x128xf32>
    %c2_20 = arith.constant 2 : index
    %c0_21 = arith.constant 0 : index
    %52 = memref.load %arg5[%c2_20, %c0_21] : memref<4x4xf32, #tpu.memory_space<smem>>
    %53 = vector.extract_strided_slice %6 {offsets = [0, 0, 0], sizes = [1, 1, 128], strides = [1, 1, 1]} : vector<1x4x128xf32> to vector<1x1x128xf32>
    %54 = vector.broadcast %52 : f32 to vector<1x1x128xf32>
    %55 = arith.mulf %54, %53 : vector<1x1x128xf32>
    %c2_22 = arith.constant 2 : index
    %c1_23 = arith.constant 1 : index
    %56 = memref.load %arg5[%c2_22, %c1_23] : memref<4x4xf32, #tpu.memory_space<smem>>
    %57 = vector.extract_strided_slice %6 {offsets = [0, 1, 0], sizes = [1, 1, 128], strides = [1, 1, 1]} : vector<1x4x128xf32> to vector<1x1x128xf32>
    %58 = vector.broadcast %56 : f32 to vector<1x1x128xf32>
    %59 = arith.mulf %58, %57 : vector<1x1x128xf32>
    %60 = arith.addf %55, %59 : vector<1x1x128xf32>
    %c2_24 = arith.constant 2 : index
    %c2_25 = arith.constant 2 : index
    %61 = memref.load %arg5[%c2_24, %c2_25] : memref<4x4xf32, #tpu.memory_space<smem>>
    %62 = vector.extract_strided_slice %6 {offsets = [0, 2, 0], sizes = [1, 1, 128], strides = [1, 1, 1]} : vector<1x4x128xf32> to vector<1x1x128xf32>
    %63 = vector.broadcast %61 : f32 to vector<1x1x128xf32>
    %64 = arith.mulf %63, %62 : vector<1x1x128xf32>
    %65 = arith.addf %60, %64 : vector<1x1x128xf32>
    %c2_26 = arith.constant 2 : index
    %c3_27 = arith.constant 3 : index
    %66 = memref.load %arg5[%c2_26, %c3_27] : memref<4x4xf32, #tpu.memory_space<smem>>
    %67 = vector.extract_strided_slice %6 {offsets = [0, 3, 0], sizes = [1, 1, 128], strides = [1, 1, 1]} : vector<1x4x128xf32> to vector<1x1x128xf32>
    %68 = vector.broadcast %66 : f32 to vector<1x1x128xf32>
    %69 = arith.mulf %68, %67 : vector<1x1x128xf32>
    %70 = arith.addf %65, %69 : vector<1x1x128xf32>
    %71 = vector.extract_strided_slice %0 {offsets = [0, 2, 0], sizes = [1, 1, 128], strides = [1, 1, 1]} : vector<1x4x128xf32> to vector<1x1x128xf32>
    %72 = arith.subf %70, %71 : vector<1x1x128xf32>
    %73 = arith.mulf %72, %72 : vector<1x1x128xf32>
    %74 = arith.addf %51, %73 : vector<1x1x128xf32>
    %c3_28 = arith.constant 3 : index
    %c0_29 = arith.constant 0 : index
    %75 = memref.load %arg5[%c3_28, %c0_29] : memref<4x4xf32, #tpu.memory_space<smem>>
    %76 = vector.extract_strided_slice %6 {offsets = [0, 0, 0], sizes = [1, 1, 128], strides = [1, 1, 1]} : vector<1x4x128xf32> to vector<1x1x128xf32>
    %77 = vector.broadcast %75 : f32 to vector<1x1x128xf32>
    %78 = arith.mulf %77, %76 : vector<1x1x128xf32>
    %c3_30 = arith.constant 3 : index
    %c1_31 = arith.constant 1 : index
    %79 = memref.load %arg5[%c3_30, %c1_31] : memref<4x4xf32, #tpu.memory_space<smem>>
    %80 = vector.extract_strided_slice %6 {offsets = [0, 1, 0], sizes = [1, 1, 128], strides = [1, 1, 1]} : vector<1x4x128xf32> to vector<1x1x128xf32>
    %81 = vector.broadcast %79 : f32 to vector<1x1x128xf32>
    %82 = arith.mulf %81, %80 : vector<1x1x128xf32>
    %83 = arith.addf %78, %82 : vector<1x1x128xf32>
    %c3_32 = arith.constant 3 : index
    %c2_33 = arith.constant 2 : index
    %84 = memref.load %arg5[%c3_32, %c2_33] : memref<4x4xf32, #tpu.memory_space<smem>>
    %85 = vector.extract_strided_slice %6 {offsets = [0, 2, 0], sizes = [1, 1, 128], strides = [1, 1, 1]} : vector<1x4x128xf32> to vector<1x1x128xf32>
    %86 = vector.broadcast %84 : f32 to vector<1x1x128xf32>
    %87 = arith.mulf %86, %85 : vector<1x1x128xf32>
    %88 = arith.addf %83, %87 : vector<1x1x128xf32>
    %c3_34 = arith.constant 3 : index
    %c3_35 = arith.constant 3 : index
    %89 = memref.load %arg5[%c3_34, %c3_35] : memref<4x4xf32, #tpu.memory_space<smem>>
    %90 = vector.extract_strided_slice %6 {offsets = [0, 3, 0], sizes = [1, 1, 128], strides = [1, 1, 1]} : vector<1x4x128xf32> to vector<1x1x128xf32>
    %91 = vector.broadcast %89 : f32 to vector<1x1x128xf32>
    %92 = arith.mulf %91, %90 : vector<1x1x128xf32>
    %93 = arith.addf %88, %92 : vector<1x1x128xf32>
    %94 = vector.extract_strided_slice %0 {offsets = [0, 3, 0], sizes = [1, 1, 128], strides = [1, 1, 1]} : vector<1x4x128xf32> to vector<1x1x128xf32>
    %95 = arith.subf %93, %94 : vector<1x1x128xf32>
    %96 = arith.mulf %95, %95 : vector<1x1x128xf32>
    %97 = arith.addf %74, %96 : vector<1x1x128xf32>
    %cst = arith.constant dense<0.000000e+00> : vector<1x128xf32>
    %98 = vector.multi_reduction <add>, %97, %cst [0] : vector<1x1x128xf32> to vector<1x128xf32>
    %99 = vector.shape_cast %98 : vector<1x128xf32> to vector<1x1x1x128xf32>
    %c0_36 = arith.constant 0 : index
    %c0_37 = arith.constant 0 : index
    %c0_38 = arith.constant 0 : index
    %c0_39 = arith.constant 0 : index
    %100 = vector.load %arg6[%c0_36, %c0_37, %c0_38, %c0_39] : memref<1x1x1x128xf32, #tpu.memory_space<vmem>>, vector<1x1x1x128xf32>
    tpu.vector_store %arg6[%c0_36, %c0_37, %c0_38, %c0_39], %99 {strides = array<i32>} : memref<1x1x1x128xf32, #tpu.memory_space<vmem>>, vector<1x1x1x128xf32>,
    return
  }
  func.func @transform_0(%arg0: i32, %arg1: i32) -> (i32, i32, i32) {
    %c0_i32 = arith.constant 0 : i32
    %c0_i32_0 = arith.constant 0 : i32
    return %arg1, %c0_i32, %arg0 : i32, i32, i32
  }
  func.func @transform_1(%arg0: i32, %arg1: i32) -> (i32, i32) {
    %c0_i32 = arith.constant 0 : i32
    %c0_i32_0 = arith.constant 0 : i32
    return %c0_i32, %arg0 : i32, i32
  }
  func.func @transform_2(%arg0: i32, %arg1: i32) -> (i32, i32, i32) {
    %c0_i32 = arith.constant 0 : i32
    %c0_i32_0 = arith.constant 0 : i32
    return %arg1, %c0_i32, %arg0 : i32, i32, i32
  }
  func.func @transform_3(%arg0: i32, %arg1: i32) -> (i32, i32) {
    %c0_i32 = arith.constant 0 : i32
    %c0_i32_0 = arith.constant 0 : i32
    %c0_i32_1 = arith.constant 0 : i32
    return %c0_i32, %c0_i32_0 : i32, i32
  }
  func.func @transform_4(%arg0: i32, %arg1: i32) -> (i32, i32, i32, i32) {
    %c0_i32 = arith.constant 0 : i32
    %c0_i32_0 = arith.constant 0 : i32
    %c0_i32_1 = arith.constant 0 : i32
    return %arg0, %arg1, %c0_i32, %c0_i32_0 : i32, i32, i32, i32
  }
}

</mosaic_0001>

<bundles_post_ra>
// kernel: tpu_custom_call.1
= control target key start
LH: loop header
LB: loop body
LE: loop exit
PB: predicated region body
PF: predicated region fallthrough
CT: control target
= control target key end

     0   :  { %s1327_s0 = inlined_call_operand.hbm [shape: f32[2,4,256], index: 0, kind: input, shape index: {}]   ;;  %s1328_s1 = inlined_call_operand.hbm [shape: f32[4,256], index: 1, kind: input, shape index: {}]   ;;  %s1329_s2 = inlined_call_operand.hbm [shape: f32[2,4,256], index: 2, kind: input, shape index: {}]   ;;  %s1330_s3 = inlined_call_operand.vmem [shape: f32[4,4], index: 3, kind: input, shape index: {}]   ;;  %s1331_s4 = inlined_call_operand.hbm [shape: f32[2,2,1,128], index: 4, kind: output, shape index: {}]  }
   0x1   :  { %1343 = sst [smem:[#allocation24_spill]] %s1328_s1 }
   0x2   :  { %1344 = sst [smem:[#allocation25_spill]] %s1330_s3 }
   0x3   :  { %1345 = sst [smem:[#allocation26_spill]] %s1331_s4 }
   0x4   :  { %9 = vsyncpa [#allocation3], 0 }
   0x5   :  { %11 = vsyncpa [#allocation3 + $0x1], 0 }
   0x6   :  { %12 = vsyncpa [#allocation7], 0 }
   0x7   :  { %14 = vsyncpa [#allocation7 + $0x1], 0 }
   0x8   :  { %15 = vsyncpa [#allocation5], 0 }
   0x9   :  { %16 = vsyncpa [#allocation4], 0 }
   0xa   :  { %18 = vsyncpa [#allocation4 + $0x1], 0  ;;  %s1017_s15 = smov 0   ;;  %s1019_s16 = smov 0  }
   0xb   :  { %s1021_s17 = smov 0   ;;  %s1023_s18 = smov 0  }
   0xc   :  { %s1025_s19 = smov 0   ;;  %s1027_s20 = smov 0  }
   0xd   :  { %s1029_s21 = smov 0   ;;  %s1031_s22 = smov 0  }
   0xe   :  { %s1033_s23 = smov 0   ;;  %s1035_s24 = smov 0  }
   0xf   :  { %s1037_s25 = smov 0  }
  0x10 LB: > { %1346 = sst [smem:[#allocation16_spill]] %s949_s16  ;;  %s36_s26 = sadd.s32 1, %s981_s24  ;;  %s985_s25 = sphi %s1037_s25, %s24_s25   ;;  %s981_s24 = sphi %s1035_s24, %s1389_s24   ;;  %s977_s23 = sphi %s1033_s23, %s1388_s23   ;;  %s973_s22 = sphi %s1031_s22, %s1387_s22   ;;  %s969_s21 = sphi %s1029_s21, %s1386_s21   ;;  %s965_s20 = sphi %s1027_s20, %s1385_s20   ;;  %s961_s19 = sphi %s1025_s19, %s1384_s19   ;;  %s957_s18 = sphi %s1023_s18, %s1383_s18   ;;  %s953_s17 = sphi %s1021_s17, %s1382_s17   ;;  %s949_s16 = sphi %s1019_s16, %s1381_s16   ;;  %s945_s15 = sphi %s1017_s15, %s1378_s15  }
  0x11   : > { %1347 = sst [smem:[#allocation17_spill]] %s957_s18  ;;  %p53_p0 = scmp.eq.s32.totalorder %s985_s25, 0 }
  0x12   : > { %1348 = sst [smem:[#allocation18_spill]] %s969_s21  ;;  %p78_p1 = scmp.ne.s32.totalorder %s953_s17, %s949_s16 }
  0x13   : > { %1349 = sst [smem:[#allocation19_spill]] %s973_s22  ;;  %p84_p2 = scmp.ne.s32.totalorder %s949_s16, %s945_s15 }
  0x14   : > { %p80_p3 = por %p78_p1, %p53_p0  ;;  %p1332_p4 = scmp.lt.s32.totalorder %s985_s25, 4 }
  0x15   : > { %s216_s28 = sand.u32 1, %s985_s25   ;;  %s218_s29 = sand.u32 1, %s953_s17  }
  0x16   : > { %s602_s30 = sshll.u32 %s218_s29, 2  ;;  %s603_s5 = sshll.u32 %s981_s24, 6 }
  0x17   : > { %s1350_s1 = sld [smem:[#allocation24_spill]]  ;;  %s220_s9 = scalar_lea.vmem [#allocation6], %s602_s30 }
  0x18   : > { %s227_s10 = sshll.u32 %s220_s9, 4  ;;  %p1090_p5 = pnand %p1332_p4, %p80_p3  ;;  %s228_s10 = int_to_ptr.vmem [resolvable:$true] %s227_s10 }
  0x19   : > { %s1094_s12 = scalar_lea.sflag [#allocation7], %s216_s28  ;;  %s767_s13 = scalar_lea.vmem %s228_s10, 64 }
  0x1a   : > { %p756_p6 = pneg %p1090_p5  ;;  %p768_p7 = scmp.ne.s32.totalorder %s228_s10, %s767_s13 }
  0x1b   : > { %s987_s14 = smov [#allocation6]  }
  0x1c   : > { %p770_p8 = pnand %p768_p7, %p756_p6  ;;  %s772_s29 = sshll.u32 %s987_s14, 4  ;;  %s773_s29 = int_to_ptr.vmem [resolvable:$false] %s772_s29 }
  0x1d   : > { %s225_s8 = scalar_lea.hbm %s1350_s1, %s603_s5  ;;  %s774_s30 = scalar_lea.vmem %s773_s29, 128 }
  0x1e   : > { %p771_p9 = pneg %p770_p8  ;;  %p775_p10 = scmp.lt.s32.totalorder %s228_s10, %s773_s29 }
  0x1f   : > { %p776_p11 = scmp.lt.s32.totalorder %s774_s30, %s767_s13 }
  0x21   : > { %p777_p12 = por %p776_p11, %p775_p10 }
  0x23   : > { %p778_p13 = pnand %p777_p12, %p771_p9 }
  0x25   : > { %781 = shalt.err (!%p778_p13)
}
  0x26   : > { %653 = dma.hbm_to_vmem [thread:$0]  (!%p1090_p5), %s225_s8, 64, %s228_s10, %s1094_s12  }
  0x27   : > { %s1102_s28 = sadd.s32 4294967295, %s985_s25   ;;  %p596_p6 = scmp.ge.s32.totalorder %s985_s25, 1 }
  0x28   : > { %p1342_p1 = scmp.eq.s32.totalorder %s1102_s28, 0  ;;  %p172_p7 = scmp.lt.s32.totalorder %s985_s25, 5 }
  0x29   : > { %s1355_s3 = sld [smem:[#allocation25_spill]] }
  0x2a   : > { %p1113_p8 = por %p84_p2, %p1342_p1  ;;  %p1117_p9 = pnand %p596_p6, %p172_p7 }
  0x2c   : > { %s1352_s5 = scalar_select %p1113_p8, 1, 0 }
  0x2d   : > { %p643_p5 = pneg %p1117_p9 }
  0x2e   : > { %1353 = sst [smem:[#allocation20_spill]] %s1352_s5 }
  0x2f   : > { %s185_s9 = sshll.u32 %s1355_s3, 4  ;;  %p644_p10 = pnand %p643_p5, %p1342_p1  ;;  %s186_s9 = int_to_ptr.vmem [resolvable:$true] %s185_s9 }
  0x30   : > { %s782_s10 = scalar_lea.vmem %s186_s9, 64  ;;  %p790_p4 = scmp.lt.s32.totalorder %s186_s9, %s186_s9 }
  0x31   : > { %p783_p11 = scmp.ne.s32.totalorder %s186_s9, %s782_s10  ;;  %p784_p2 = pneg %p644_p10 }
  0x32   : > { %p791_p6 = scmp.lt.s32.totalorder %s782_s10, %s782_s10 }
  0x33   : > { %p785_p12 = pnand %p784_p2, %p783_p11 }
  0x34   : > { %p792_p7 = por %p791_p6, %p790_p4 }
  0x35   : > { %p786_p13 = pneg %p785_p12 }
  0x37   : > { %p793_p3 = pnand %p792_p7, %p786_p13 }
  0x39   : > { %796 = shalt.err (!%p793_p3)
}
  0x3a   : > { %s988_s15 = smov [#allocation9]   ;;  %s595_s11 = sadd.s32 4294967294, %s985_s25  }
  0x3b   : > { %646 = dma.vmem_to_smem (!%p644_p10), %s186_s9, 64, %s988_s15, [#allocation5]  }
  0x3c   : > { %s33_s13 = sadd.s32 1, %s977_s23  ;;  %s45_s14 = sadd.s32 1, %s965_s20 }
  0x3d   : > { %p34_p4 = scmp.ge.s32.totalorder %s33_s13, 2  ;;  %p52_p3 = scmp.ne.s32.totalorder %s965_s20, %s961_s19 }
  0x3e   : > { %p58_p5 = scmp.ne.s32.totalorder %s961_s19, %s957_s18  ;;  %p165_p11 = scmp.eq.s32.totalorder %s595_s11, 3 }
  0x3f   : > { %s1391_s13 = smov (%p34_p4, %s33_s13), 0  ;;  %s1393_s26 = smov (!%p34_p4, %s36_s26), %s981_s24 }
  0x40   : > { %1356 = sst [smem:[#allocation21_spill]] %s1391_s13  ;;  %s40_s29 = ssub.s32 %s977_s23, %s1391_s13 }
  0x41   : > { %p1144_p10 = por %p53_p0, %p52_p3  ;;  %p38_p2 = scmp.ge.s32.totalorder %s1393_s26, 2 }
  0x42   : > { %p1150_p12 = por %p1342_p1, %p58_p5  ;;  %p1359_p13 = scmp.eq.s32.totalorder %s1102_s28, 3 }
  0x43   : > { %p1160_p7 = por %p165_p11, %p58_p5  ;;  %s1395_s26 = smov (%p38_p2, %s1393_s26), 0 }
  0x44   : > { %p1156_p6 = por %p1359_p13, %p52_p3  ;;  %s196_s10 = sand.u32 1, %s965_s20  }
  0x45   : > { %s1362_s9 = scalar_select %p1160_p7, 1, 0 }
  0x46   : > { %s1360_s8 = scalar_select %p1156_p6, 1, 0 }
  0x47   : > { %1363 = sst [smem:[#allocation23_spill]] %s1362_s9  ;;  %s600_s15 = sshll.u32 %s977_s23, 1 }
  0x48   : > { %1361 = sst [smem:[#allocation22_spill]] %s1360_s8  ;;  %s41_s11 = ssub.s32 %s981_s24, %s1395_s26 }
  0x49   : > { %s42_s27 = sor.u32 %s41_s11, %s40_s29  ;;  %p69_p0 = scmp.eq.s32.totalorder %s41_s11, 0 }
  0x4a   : > { %p43_p4 = scmp.eq.s32.totalorder %s42_s27, 0  ;;  %s599_s1 = sshll.u32 %s196_s10, 2 }
  0x4b   : > { %s1364_s3 = sadd.s32 1, %s953_s17  ;;  %s205_s4 = sadd.s32 %s981_s24, %s600_s15 }
  0x4c   : > { %s1173_s13 = scalar_select %p69_p0, %s953_s17, %s1364_s3  }
  0x4d   : > { %s1176_s18 = scalar_select %p43_p4, %s965_s20, %s45_s14  }
  0x4e   : > { %s601_s8 = sshll.u32 %s205_s4, 6  ;;  %s200_s9 = scalar_lea.vmem [#allocation2], %s599_s1 }
  0x4f   : > { %s209_s21 = sshll.u32 %s200_s9, 4  ;;  %s207_s16 = scalar_lea.hbm %s1327_s0, %s601_s8  ;;  %s210_s21 = int_to_ptr.vmem [resolvable:$true] %s209_s21 }
  0x50   : > { %p1365_p3 = scmp.lt.s32.totalorder %s985_s25, 4  ;;  %s1193_s14 = scalar_lea.hbm %s1329_s2, %s601_s8 }
  0x51   : > { %s238_s4 = scalar_lea.vmem [#allocation8], %s599_s1  ;;  %s197_s22 = scalar_lea.sflag [#allocation3], %s196_s10 }
  0x52   : > { %p1186_p5 = pnand %p1365_p3, %p1144_p10  ;;  %s247_s9 = sshll.u32 %s238_s4, 4  ;;  %s1195_s9 = int_to_ptr.vmem [resolvable:$true] %s247_s9 }
  0x53   : > { %s810_s5 = scalar_lea.vmem %s210_s21, 64  ;;  %s989_s30 = smov [#allocation2]  }
  0x54   : > { %p799_p11 = pneg %p1186_p5  ;;  %p811_p2 = scmp.ne.s32.totalorder %s210_s21, %s810_s5 }
  0x55   : > { %s815_s15 = sshll.u32 %s989_s30, 4  ;;  %s816_s15 = int_to_ptr.vmem [resolvable:$false] %s815_s15 }
  0x56   : > { %p813_p10 = pnand %p811_p2, %p799_p11  ;;  %s817_s11 = scalar_lea.vmem %s816_s15, 128 }
  0x57   : > { %p818_p0 = scmp.lt.s32.totalorder %s210_s21, %s816_s15  ;;  %p819_p4 = scmp.lt.s32.totalorder %s817_s11, %s810_s5 }
  0x58   : > { %p814_p13 = pneg %p813_p10 }
  0x59   : > { %p820_p3 = por %p819_p4, %p818_p0 }
  0x5b   : > { %p821_p1 = pnand %p820_p3, %p814_p13 }
  0x5d   : > { %824 = shalt.err (!%p821_p1)
}
  0x5e   : > { %650 = dma.hbm_to_vmem [thread:$0]  (!%p1186_p5), %s207_s16, 64, %s210_s21, %s197_s22  }
  0x5f   : > { %s838_s1 = scalar_lea.vmem %s1195_s9, 64  ;;  %s990_s8 = smov [#allocation8]  }
  0x60   : > { %p839_p7 = scmp.ne.s32.totalorder %s1195_s9, %s838_s1  ;;  %s843_s10 = sshll.u32 %s990_s8, 4  ;;  %s844_s10 = int_to_ptr.vmem [resolvable:$false] %s843_s10 }
  0x61   : > { %s845_s27 = scalar_lea.vmem %s844_s10, 128  ;;  %p846_p0 = scmp.lt.s32.totalorder %s1195_s9, %s844_s10 }
  0x62   : > { %p841_p2 = pnand %p839_p7, %p799_p11  ;;  %p847_p13 = scmp.lt.s32.totalorder %s845_s27, %s838_s1 }
  0x64   : > { %p842_p10 = pneg %p841_p2  ;;  %p848_p1 = por %p847_p13, %p846_p0 }
  0x66   : > { %p849_p4 = pnand %p848_p1, %p842_p10 }
  0x68   : > { %852 = shalt.err (!%p849_p4)
}
  0x69   : > { %656 = dma.hbm_to_vmem [thread:$0]  (!%p1186_p5), %s1193_s14, 64, %s1195_s9, %s1094_s12  }
  0x6a   : > { %256 = sbr.rel (%p1117_p9) target bundleno = 181 (0xb5), region = 36  ;;  %s1218_s16 = sand.u32 (!%p1117_p9), 1, %s961_s19  }
  0x6b   : > { %s608_s21 = sshll.u32 (!%p1117_p9), %s1218_s16, 2  ;;  %s259_s3 = scalar_lea.sflag (!%p1117_p9), [#allocation3], %s1218_s16 }
  0x6c   : > { %s262_s4 = scalar_lea.vmem (!%p1117_p9), [#allocation2], %s608_s21 }
  0x6f   : > { %924 = dma.done.wait (%p1150_p12), %s259_s3, 64  }
  0x70   : > { %926 = vsyncadd (%p1150_p12), %s259_s3, 4294967232  ;;  %s1367_s29 = sld [smem:[#allocation16_spill]]  ;;  %s267_s14 = sand.u32 1, %s1102_s28  }
  0x71   : > { %s268_s22 = scalar_lea.sflag [#allocation7], %s267_s14 }
  0x76   : > { %s269_s6 = sand.u32 1, %s1367_s29  }
  0x77   : > { %s609_s9 = sshll.u32 %s269_s6, 2 }
  0x78   : > { %s271_s5 = scalar_lea.vmem [#allocation6], %s609_s9 }
  0x79   : > { %928 = dma.done.wait (%p1113_p8), %s268_s22, 64  }
  0x7a   : > { %930 = vsyncadd (%p1113_p8), %s268_s22, 4294967232  ;;  %s280_s30 = scalar_lea.vmem [#allocation8], %s608_s21 }
  0x7b   : > { %932 = dma.done.wait (%p1150_p12), %s268_s22, 64  }
  0x7c   : > { %934 = vsyncadd (%p1150_p12), %s268_s22, 4294967232  ;;  %p1369_p9 = scmp.eq.s32.totalorder %s1102_s28, 0 }
  0x7e   : > { %936 = dma.done.wait (%p1369_p9), [#allocation5], 64   ;;  %p1370_p7 = pmov %p1369_p9 }
  0x80   : > { %938 = vsyncadd (%p1370_p7), [#allocation5], 4294967232 }
  0x81   : > { %289 = sfence }
  0x82   : > { %v1240_v0 = vld [vmem:[%s262_s4] sm:$0xf]  ;;  %v320_v1 = vld [vmem:[%s271_s5] sm:$0xf]  ;;  %v322_v3 = vld [vmem:[%s280_s30] sm:$0xf] }
  0x83   : > { %v321_v2 = vmul.f32 %v320_v1, %v1240_v0  ;;  %s325_s15 = sld [smem:[#allocation9]]  ;;  %v376_v39 = vrot.slane %v1240_v0, 1  ;;  %v405_v49 = vrot.slane %v1240_v0, 2 }
  0x84   : > { %s612_s11 = sld [smem:[#allocation9 + $0x1]] }
  0x85   : > { %v323_v4 = vadd.f32 %v322_v3, %v321_v2  ;;  %s613_s1 = sld [smem:[#allocation9 + $0x2]] }
  0x86   : > { %s614_s8 = sld [smem:[#allocation9 + $0x3]] }
  0x87   : > { %v1243_v5 = vmul.f32 %v323_v4, %v320_v1  ;;  %s615_s7 = sld [smem:[#allocation9 + $0x80]] }
  0x88   : > { %s616_s10 = sld [smem:[#allocation9 + $0x81]] }
  0x89   : > { %v326_v6 = vstv %s325_s15  ;;  %s617_s27 = sld [smem:[#allocation9 + $0x82]] }
  0x8a   : > { %v329_v7 = vstv %s612_s11  ;;  %s618_s28 = sld [smem:[#allocation9 + $0x83]]  ;;  %v327_v8 = vmul.f32 %v326_v6, %v1243_v5 }
  0x8b   : > { %v330_v9 = vmul.f32 %v329_v7, %v1243_v5  ;;  %v336_v10 = vstv %s613_s1  ;;  %s619_s21 = sld [smem:[#allocation9 + $0x100]]  ;;  %v434_v7 = vrot.slane %v1240_v0, 3  ;;  %s318_s1 = scalar_lea.vmem [#allocation10], %s1218_s16 }
  0x8c   : > { %v337_v11 = vmul.f32 %v336_v10, %v1243_v5  ;;  %v343_v12 = vstv %s614_s8  ;;  %s620_s3 = sld [smem:[#allocation9 + $0x101]]  ;;  %s456_s8 = sshll.u32 %s318_s1, 4  ;;  %s457_s8 = int_to_ptr.vmem [resolvable:$true] %s456_s8 }
  0x8d   : > { %v332_v13 = vrot.slane %v330_v9, 1  ;;  %v344_v14 = vmul.f32 %v343_v12, %v1243_v5  ;;  %v352_v15 = vstv %s615_s7  ;;  %s1249_s4 = sld [smem:[#allocation9 + $0x102]] }
  0x8e   : > { %v339_v16 = vrot.slane %v337_v11, 2  ;;  %v353_v17 = vmul.f32 %v352_v15, %v1243_v5  ;;  %v355_v18 = vstv %s616_s10  ;;  %s622_s29 = sld [smem:[#allocation9 + $0x103]] }
  0x8f   : > { %v334_v19 = vadd.f32 %v332_v13, %v327_v8  ;;  %v346_v20 = vrot.slane %v344_v14, 3  ;;  %v356_v21 = vmul.f32 %v355_v18, %v1243_v5  ;;  %v362_v22 = vstv %s617_s27  ;;  %s1253_s12 = sld [smem:[#allocation9 + $0x180]] }
  0x90   : > { %v363_v23 = vmul.f32 %v362_v22, %v1243_v5  ;;  %v369_v24 = vstv %s618_s28  ;;  %s624_s14 = sld [smem:[#allocation9 + $0x181]] }
  0x91   : > { %v341_v25 = vadd.f32 %v339_v16, %v334_v19  ;;  %v358_v26 = vrot.slane %v356_v21, 1  ;;  %v370_v27 = vmul.f32 %v369_v24, %v1243_v5  ;;  %v382_v28 = vstv %s619_s21  ;;  %s625_s6 = sld [smem:[#allocation9 + $0x182]] }
  0x92   : > { %v365_v29 = vrot.slane %v363_v23, 2  ;;  %v383_v30 = vmul.f32 %v382_v28, %v1243_v5  ;;  %v385_v31 = vstv %s620_s3  ;;  %s626_s9 = sld [smem:[#allocation9 + $0x183]]  ;;  %s442_s3 = scalar_lea.sflag [#allocation4], %s1218_s16 }
  0x93   : > { %v348_v32 = vadd.f32 %v346_v20, %v341_v25  ;;  %v360_v33 = vadd.f32 %v358_v26, %v353_v17  ;;  %v372_v34 = vrot.slane %v370_v27, 3  ;;  %v386_v35 = vmul.f32 %v385_v31, %v1243_v5  ;;  %s1371_s22 = sld [smem:[#allocation19_spill]] }
  0x94   : > { %v392_v36 = vstv %s1249_s4  ;;  %v399_v37 = vstv %s622_s29  ;;  %s1372_s5 = sld [smem:[#allocation18_spill]]  ;;  %s853_s4 = scalar_lea.vmem %s457_s8, 16 }
  0x95   : > { %v367_v38 = vadd.f32 %v365_v29, %v360_v33  ;;  %v388_v40 = vrot.slane %v386_v35, 1  ;;  %v393_v41 = vmul.f32 %v392_v36, %v1243_v5  ;;  %v349_v42 = vsub.f32 %v348_v32, %v1240_v0  ;;  %s1374_s28 = sld [smem:[#allocation26_spill]]  ;;  %p854_p8 = scmp.ne.s32.totalorder %s457_s8, %s853_s4 }
  0x96   : > { %v400_v43 = vmul.f32 %v399_v37, %v1243_v5  ;;  %v411_v44 = vstv %s1253_s12  ;;  %v414_v45 = vstv %s624_s14  ;;  %s991_s29 = smov [#allocation10]  }
  0x97   : > { %v374_v46 = vadd.f32 %v372_v34, %v367_v38  ;;  %v390_v47 = vadd.f32 %v388_v40, %v383_v30  ;;  %v395_v48 = vrot.slane %v393_v41, 2  ;;  %v412_v51 = vmul.f32 %v411_v44, %v1243_v5  ;;  %p855_p12 = pnand %p854_p8, %p1156_p6  ;;  %s857_s12 = sshll.u32 %s991_s29, 4  ;;  %s858_s12 = int_to_ptr.vmem [resolvable:$false] %s857_s12 }
  0x98   : > { %v402_v50 = vrot.slane %v400_v43, 3  ;;  %v415_v52 = vmul.f32 %v414_v45, %v1243_v5  ;;  %v421_v53 = vstv %s625_s6  ;;  %v428_v57 = vstv %s626_s9  ;;  %s859_s14 = scalar_lea.vmem %s858_s12, 32  ;;  %p860_p11 = scmp.lt.s32.totalorder %s457_s8, %s858_s12 }
  0x99   : > { %v378_v54 = vsub.f32 %v374_v46, %v376_v39  ;;  %v397_v55 = vadd.f32 %v395_v48, %v390_v47  ;;  %v422_v56 = vmul.f32 %v421_v53, %v1243_v5  ;;  %v350_v58 = vmul.f32 %v349_v42, %v349_v42  ;;  %s627_s30 = sshll.u32 %s1371_s22, 1  ;;  %p856_p5 = pneg %p855_p12 }
  0x9a   : > { %v417_v59 = vrot.slane %v415_v52, 1  ;;  %v429_v60 = vmul.f32 %v428_v57, %v1243_v5  ;;  %s452_s11 = sadd.s32 %s1372_s5, %s627_s30  ;;  %p861_p3 = scmp.lt.s32.totalorder %s859_s14, %s853_s4 }
  0x9b   : > { %v379_v61 = vmul.f32 %v378_v54, %v378_v54  ;;  %v404_v62 = vadd.f32 %v402_v50, %v397_v55  ;;  %v424_v63 = vrot.slane %v422_v56, 2  ;;  %s628_s7 = sshll.u32 %s452_s11, 4 }
  0x9c   : > { %v419_v1 = vadd.f32 %v417_v59, %v412_v51  ;;  %v431_v2 = vrot.slane %v429_v60, 3  ;;  %s454_s21 = scalar_lea.hbm %s1374_s28, %s628_s7  ;;  %p862_p2 = por %p861_p3, %p860_p11 }
  0x9d   : > { %v407_v3 = vsub.f32 %v404_v62, %v405_v49  ;;  %v380_v4 = vadd.f32 %v379_v61, %v350_v58 }
  0x9e   : > { %v426_v6 = vadd.f32 %v424_v63, %v419_v1  ;;  %p863_p10 = pnand %p862_p2, %p856_p5 }
  0x9f   : > { %v408_v8 = vmul.f32 %v407_v3, %v407_v3 }
  0xa0   : > { %v433_v9 = vadd.f32 %v431_v2, %v426_v6 }
  0xa1   : > { %v409_v10 = vadd.f32 %v408_v8, %v380_v4 }
  0xa2   : > { %v436_v11 = vsub.f32 %v433_v9, %v434_v7 }
  0xa4   : > { %v437_v5 = vmul.f32 %v436_v11, %v436_v11 }
  0xa6   : > { %v438_v12 = vadd.f32 %v437_v5, %v409_v10 }
  0xa8   : > { %440 = vst [vmem:[%s318_s1] sm:$0x1] %v438_v12 }
  0xa9   : > { %866 = shalt.err (!%p863_p10)
}
  0xaa   : > { %s867_s6 = scalar_lea.hbm %s454_s21, 16  ;;  %s871_s22 = scalar_lea.hbm %s1374_s28, 64 }
  0xab   : > { %p868_p0 = scmp.ne.s32.totalorder %s454_s21, %s867_s6  ;;  %p872_p4 = scmp.lt.s32.totalorder %s454_s21, %s1374_s28 }
  0xac   : > { %p873_p9 = scmp.lt.s32.totalorder %s871_s22, %s867_s6 }
  0xad   : > { %p869_p13 = pnand %p868_p0, %p1156_p6 }
  0xae   : > { %p874_p7 = por %p873_p9, %p872_p4 }
  0xaf   : > { %p870_p1 = pneg %p869_p13 }
  0xb1   : > { %p875_p8 = pnand %p874_p7, %p870_p1 }
  0xb3   : > { %878 = shalt.err (!%p875_p8)
}
  0xb4   : > { %641 = dma.vmem_to_hbm [thread:$0]  (%p1156_p6), %s457_s8, 16, %s454_s21, %s442_s3  }
  0xb5 PF: > { %s1375_s11 = sld [smem:[#allocation17_spill]]  ;;  %p664_p12 = scmp.ge.s32.totalorder %s985_s25, 2 }
  0xb6   : > { %s1376_s1 = sld [smem:[#allocation23_spill]] }
  0xbb   : > { %s468_s7 = sand.u32 1, %s1375_s11  }
  0xbc   : > { %p1377_p5 = scmp.ne.s32.totalorder %s1376_s1, 0  ;;  %s469_s10 = scalar_lea.sflag [#allocation4], %s468_s7 }
  0xbe   : > { %p658_p11 = pnand %p664_p12, %p1377_p5 }
  0xc0   : > { %p659_p3 = pneg %p658_p11 }
  0xc2   : > { %940 = dma.done.wait (%p659_p3), %s469_s10, 16  }
  0xc3   : > { %942 = vsyncadd (%p659_p3), %s469_s10, 4294967280  ;;  %s24_s25 = sadd.s32 1, %s985_s25   ;;  %s1378_s15 = sld [smem:[#allocation16_spill]] }
  0xc4   : > { %p21_p2 = scmp.ge.s32.totalorder %s24_s25, 6   ;;  %s1379_s8 = smov %s1176_s18 }
  0xc5   : > { %s1380_s27 = sld [smem:[#allocation21_spill]]  ;;  %s1381_s16 = smov %s953_s17 }
  0xc6   : > { %s1382_s17 = smov %s1173_s13  ;;  %s1383_s18 = smov %s961_s19 }
  0xc7   : > { %s1384_s19 = smov %s965_s20  ;;  %s1385_s20 = smov %s1379_s8 }
  0xc8   : > { %s1386_s21 = smov %s977_s23  ;;  %s1387_s22 = smov %s981_s24 }
  0xc9   : > { %s1389_s24 = smov %s1395_s26  ;;  %23 = sbr.rel (!%p21_p2) target bundleno = 16 (0x10), region = 110 }
  0xcb   : > { %s1388_s23 = smov %s1380_s27 }
  0xce   :  { %473 = vsyncpa [#allocation3], 1 }
  0xcf   :  { %475 = vsyncpa [#allocation3 + $0x1], 1 }
  0xd0   :  { %476 = vsyncpa [#allocation7], 1 }
  0xd1   :  { %478 = vsyncpa [#allocation7 + $0x1], 1 }
  0xd2   :  { %479 = vsyncpa [#allocation4], 1 }
  0xd3   :  { %481 = vsyncpa [#allocation4 + $0x1], 1 }
  0xd4   :  { %482 = vsyncpa [#allocation5], 1 }
  0xd5   :  { %484 = vsyncpa [#allocation5 + $0x1], 1 }

</bundles_post_ra>
